<compile_context>
chip_gen: v7x
topology: tpu7x:2x2x1
jax: 0.10.0
libtpu: 0.0.40
codegen_flags: <defaults>
</compile_context>

<pallas_src>
import functools

import numpy as np
import jax
import jax.numpy as jnp
from jax.experimental import pallas as pl
from jax.experimental.pallas import tpu as pltpu


# ----------------------------------------------------------------------------
# Fused kernel: deconv (phase scatter matmuls) + F.pad + channel concat
# ----------------------------------------------------------------------------
def _up_fused_kernel(x1_ref, x2_ref, scol_ref, srow_ref, wmix_ref, biasp_ref,
                     o_ref, *, nb, c2, cout):
    # x1_ref   : (nb, Cin, H*W)            VMEM   flattened NCHW input
    # x2_ref   : (nb, C2, Hout*Wout)       VMEM   flattened skip connection
    # scol_ref : (3, H*W, H*Wout)          VMEM   0/1 column-phase scatter (+w_off)
    # srow_ref : (3, H*Wout, Hout*Wout)    VMEM   0/1 row-phase scatter (+h_off)
    # wmix_ref : (3, 3, Cout, Cin)         VMEM   premixed ConvTranspose weights (f32)
    # biasp_ref: (Cout, Hout*Wout)         VMEM   bias * footprint mask (f32)
    # o_ref    : (nb, C2+Cout, Hout*Wout)  VMEM   final cat([x2, pad(up(x1))]) block
    f32 = jnp.float32

    for bb in range(nb):                       # batch elements folded into this step
        # ---- fused concat: skip connection -> channels [0:C2], lane-dense ----
        o_ref[bb, 0:c2, :] = x2_ref[bb].astype(o_ref.dtype)

        # ---- deconv: sub-pixel phase decomposition as a few fat matmuls ------
        x = x1_ref[bb]                                            # (Cin, H*W)
        # column-phase placement (+ F.pad col offset), one matmul per kx
        u = [jnp.dot(x, scol_ref[kx], preferred_element_type=f32)  # (Cin, H*Wout)
             for kx in range(3)]

        # channel mix (weights pre-folded in the wrapper) + row-phase placement
        acc = biasp_ref[...]                                      # (Cout, Hout*Wout)
        for ky in range(3):
            t = jnp.dot(wmix_ref[ky, 0], u[0], preferred_element_type=f32)
            t = t + jnp.dot(wmix_ref[ky, 1], u[1], preferred_element_type=f32)
            t = t + jnp.dot(wmix_ref[ky, 2], u[2], preferred_element_type=f32)
            acc = acc + jnp.dot(t, srow_ref[ky], preferred_element_type=f32)

        o_ref[bb, c2:c2 + cout, :] = acc.astype(o_ref.dtype)


# ----------------------------------------------------------------------------
# Wrapper-side precompute of the 0/1 phase-scatter matrices (exact, tiny)
# ----------------------------------------------------------------------------
def _build_scatter(h, w, hout, wout, h_off, w_off):
    q, hwo, p = h * w, h * wout, hout * wout
    scol = np.zeros((3, q, hwo), np.float32)     # (i,j) -> (i, w_off + 2j+kx-1)
    srow = np.zeros((3, hwo, p), np.float32)     # (i,ow) -> (h_off + 2i+ky-1, ow)
    for kx in range(3):
        for j in range(w):
            ow = 2 * j + kx - 1
            if 0 <= ow < 2 * w:
                for i in range(h):
                    scol[kx, i * w + j, i * wout + w_off + ow] = 1.0
    cols = np.arange(wout)
    for ky in range(3):
        for i in range(h):
            oh = 2 * i + ky - 1
            if 0 <= oh < 2 * h:
                srow[ky, i * wout + cols, (h_off + oh) * wout + cols] = 1.0
    region = np.zeros((hout, wout), np.float32)  # deconv footprint (bias only here)
    region[h_off:h_off + 2 * h, w_off:w_off + 2 * w] = 1.0
    return scol, srow, region.reshape(-1)


# ----------------------------------------------------------------------------
# Up.forward (bilinear=False, transformer=None), NCHW in / NCHW out
# ----------------------------------------------------------------------------
def up_forward(X, w_deconv, bias, transformer=None):
    """cat([x2, F.pad(ConvTranspose2d(x1))], dim=1) as a single pallas_call."""
    # TODO(synk): transformer branch (`self.up(transformer(x1)[0])`) and the
    # bilinear=True Upsample path are not implemented.
    x1, x2 = X
    assert transformer is None
    n, cin, h, w = x1.shape
    n2, c2, hout, wout = x2.shape
    assert n2 == n
    cout = w_deconv.shape[1]
    h_diff, w_diff = hout - 2 * h, wout - 2 * w
    assert h_diff >= 0 and w_diff >= 0, "negative F.pad (crop) not supported"
    h_off, w_off = h_diff // 2, w_diff // 2
    q, hwo, p = h * w, h * wout, hout * wout

    # ---- precompute: 0/1 scatter matrices, premixed weights, bias plane -----
    scol_np, srow_np, region_np = _build_scatter(h, w, hout, wout, h_off, w_off)
    scol = jnp.asarray(scol_np, dtype=x1.dtype)    # exact 0/1 (safe in bf16 too)
    srow = jnp.asarray(srow_np, dtype=x1.dtype)
    # wmix[ky, kx, co, ci] = w[ci, co, ky, kx]; kept f32 (params may be bf16)
    wmix = jnp.transpose(w_deconv.astype(jnp.float32), (2, 3, 1, 0))
    # bias only inside the deconv footprint; the F.pad border stays exactly 0
    biasp = bias.astype(jnp.float32)[:, None] * jnp.asarray(region_np)[None, :]

    # ---- free layout plumbing: contiguous NCHW -> lane-dense (N, C, H*W) ----
    x1r = x1.reshape(n, cin, q)
    x2r = x2.reshape(n, c2, p)

    # ---- grid: at most 2 steps; >=2 when possible so both v7x TCs get work --
    if n >= 2 and n % 2 == 0:
        nsteps = 2
    else:
        nsteps = n                      # n == 1, or odd n: one element per step
    nb = n // nsteps

    kernel = functools.partial(_up_fused_kernel, nb=nb, c2=c2, cout=cout)

    out = pl.pallas_call(
        kernel,
        out_shape=jax.ShapeDtypeStruct((n, c2 + cout, p), x1.dtype),
        grid=(nsteps,),
        in_specs=[
            pl.BlockSpec((nb, cin, q), lambda i: (i, 0, 0)),          # x1 (flat)
            pl.BlockSpec((nb, c2, p), lambda i: (i, 0, 0)),           # x2 (flat)
            pl.BlockSpec((3, q, hwo), lambda i: (0, 0, 0)),           # scol (1 DMA)
            pl.BlockSpec((3, hwo, p), lambda i: (0, 0, 0)),           # srow (1 DMA)
            pl.BlockSpec((3, 3, cout, cin), lambda i: (0, 0, 0, 0)),  # weights
            pl.BlockSpec((cout, p), lambda i: (0, 0)),                # bias plane
        ],
        out_specs=pl.BlockSpec((nb, c2 + cout, p), lambda i: (i, 0, 0)),
        compiler_params=pltpu.CompilerParams(
            dimension_semantics=("parallel",)),
    )(x1r, x2r, scol, srow, wmix, biasp)

    return out.reshape(n, c2 + cout, hout, wout)


# ----------------------------------------------------------------------------
# Pure-JAX reference (independent of the Pallas path) for verification
# ----------------------------------------------------------------------------
def up_forward_ref(X, w_deconv, bias):
    x1, x2 = X
    cout = w_deconv.shape[1]
    w_oihw = jnp.transpose(jnp.flip(w_deconv, axis=(2, 3)), (1, 0, 2, 3))
    y = jax.lax.conv_general_dilated(
        x1, w_oihw, window_strides=(1, 1), padding=((1, 2), (1, 2)),
        lhs_dilation=(2, 2), rhs_dilation=(1, 1),
        dimension_numbers=('NCHW', 'OIHW', 'NCHW'),
        precision=jax.lax.Precision.HIGHEST)
    y = y + bias.reshape(1, cout, 1, 1)
    h_diff = x2.shape[2] - y.shape[2]
    w_diff = x2.shape[3] - y.shape[3]
    y = jnp.pad(y, ((0, 0), (0, 0),
                    (h_diff // 2, h_diff - h_diff // 2),
                    (w_diff // 2, w_diff - w_diff // 2)))
    return jnp.concatenate([x2, y], axis=1)


if __name__ == "__main__":
    key = jax.random.PRNGKey(0)
    k1, k2, k3, k4 = jax.random.split(key, 4)

    N, IC, OC, H, W = 2, 4, 4, 8, 8            # Up(in_channels=4, out_channels=4)
    x1 = jax.random.normal(k1, (N, IC, H, W), jnp.float32)           # NCHW
    x2 = jax.random.normal(k2, (N, IC, 2 * H, 2 * W), jnp.float32)   # NCHW skip
    # ConvTranspose2d weight: (in_channels, out_channels, 3, 3) + bias (out_channels,)
    w_deconv = 0.1 * jax.random.normal(k3, (IC, OC, 3, 3), jnp.float32)
    bias = 0.1 * jax.random.normal(k4, (OC,), jnp.float32)

    out = jax.block_until_ready(up_forward((x1, x2), w_deconv, bias,
                                           transformer=None))
    ref = jax.block_until_ready(up_forward_ref((x1, x2), w_deconv, bias))

    assert out.shape == (N, IC + OC, 2 * H, 2 * W), out.shape
    assert np.allclose(np.asarray(out), np.asarray(ref), rtol=2e-3, atol=2e-3)
    print("KERNEL_OK")
</pallas_src>

<mosaic_0001>
module attributes {stable_mosaic.version = 11 : i64} {
  func.func @_up_fused_kernel(%arg0: i32, %arg1: memref<1x4x64xf32, #tpu.memory_space<vmem>>, %arg2: memref<1x4x256xf32, #tpu.memory_space<vmem>>, %arg3: memref<3x64x128xf32, #tpu.memory_space<vmem>>, %arg4: memref<3x128x256xf32, #tpu.memory_space<vmem>>, %arg5: memref<3x3x4x4xf32, #tpu.memory_space<vmem>>, %arg6: memref<4x256xf32, #tpu.memory_space<vmem>>, %arg7: memref<1x8x256xf32, #tpu.memory_space<vmem>>) attributes {dimension_semantics = [#tpu.dimension_semantics<parallel>], iteration_bounds = array<i64: 2>, scalar_prefetch = 0 : i64, scratch_operands = 0 : i64, tpu.core_type = #tpu.core_type<tc>, window_params = [{transform_indices = @transform_0, window_bounds = array<i64: 1, 4, 64>}, {transform_indices = @transform_1, window_bounds = array<i64: 1, 4, 256>}, {pipeline_mode = #tpu.pipeline_mode<synchronous>, transform_indices = @transform_2, window_bounds = array<i64: 3, 64, 128>}, {pipeline_mode = #tpu.pipeline_mode<synchronous>, transform_indices = @transform_3, window_bounds = array<i64: 3, 128, 256>}, {pipeline_mode = #tpu.pipeline_mode<synchronous>, transform_indices = @transform_4, window_bounds = array<i64: 3, 3, 4, 4>}, {pipeline_mode = #tpu.pipeline_mode<synchronous>, transform_indices = @transform_5, window_bounds = array<i64: 4, 256>}, {transform_indices = @transform_6, window_bounds = array<i64: 1, 8, 256>}]} {
    %c0 = arith.constant 0 : index
    %c0_0 = arith.constant 0 : index
    %c0_1 = arith.constant 0 : index
    %0 = vector.load %arg2[%c0, %c0_0, %c0_1] : memref<1x4x256xf32, #tpu.memory_space<vmem>>, vector<1x4x256xf32>
    %1 = vector.shape_cast %0 : vector<1x4x256xf32> to vector<4x256xf32>
    %c0_2 = arith.constant 0 : index
    %c0_3 = arith.constant 0 : index
    %c0_4 = arith.constant 0 : index
    %2 = vector.load %arg7[%c0_2, %c0_3, %c0_4] : memref<1x8x256xf32, #tpu.memory_space<vmem>>, vector<1x4x256xf32>
    %3 = vector.shape_cast %2 : vector<1x4x256xf32> to vector<4x256xf32>
    %4 = vector.shape_cast %1 : vector<4x256xf32> to vector<1x4x256xf32>
    tpu.vector_store %arg7[%c0_2, %c0_3, %c0_4], %4 {strides = array<i32>} : memref<1x8x256xf32, #tpu.memory_space<vmem>>, vector<1x4x256xf32>,
    %c0_5 = arith.constant 0 : index
    %c0_6 = arith.constant 0 : index
    %c0_7 = arith.constant 0 : index
    %5 = vector.load %arg1[%c0_5, %c0_6, %c0_7] : memref<1x4x64xf32, #tpu.memory_space<vmem>>, vector<1x4x64xf32>
    %6 = vector.shape_cast %5 : vector<1x4x64xf32> to vector<4x64xf32>
    %c0_8 = arith.constant 0 : index
    %c0_9 = arith.constant 0 : index
    %c0_10 = arith.constant 0 : index
    %7 = vector.load %arg3[%c0_8, %c0_9, %c0_10] : memref<3x64x128xf32, #tpu.memory_space<vmem>>, vector<1x64x128xf32>
    %8 = vector.shape_cast %7 : vector<1x64x128xf32> to vector<64x128xf32>
    %cst = arith.constant dense<0.000000e+00> : vector<4x128xf32>
    %9 = tpu.matmul %6, %8, %cst {dimension_numbers = #tpu.dot_dimension_numbers<[1], [0], [0], [1], [0, 0, 1, 1], [], []>} : vector<4x64xf32>, vector<64x128xf32>, vector<4x128xf32> -> vector<4x128xf32>
    %c1 = arith.constant 1 : index
    %c0_11 = arith.constant 0 : index
    %c0_12 = arith.constant 0 : index
    %10 = vector.load %arg3[%c1, %c0_11, %c0_12] : memref<3x64x128xf32, #tpu.memory_space<vmem>>, vector<1x64x128xf32>
    %11 = vector.shape_cast %10 : vector<1x64x128xf32> to vector<64x128xf32>
    %cst_13 = arith.constant dense<0.000000e+00> : vector<4x128xf32>
    %12 = tpu.matmul %6, %11, %cst_13 {dimension_numbers = #tpu.dot_dimension_numbers<[1], [0], [0], [1], [0, 0, 1, 1], [], []>} : vector<4x64xf32>, vector<64x128xf32>, vector<4x128xf32> -> vector<4x128xf32>
    %c2 = arith.constant 2 : index
    %c0_14 = arith.constant 0 : index
    %c0_15 = arith.constant 0 : index
    %13 = vector.load %arg3[%c2, %c0_14, %c0_15] : memref<3x64x128xf32, #tpu.memory_space<vmem>>, vector<1x64x128xf32>
    %14 = vector.shape_cast %13 : vector<1x64x128xf32> to vector<64x128xf32>
    %cst_16 = arith.constant dense<0.000000e+00> : vector<4x128xf32>
    %15 = tpu.matmul %6, %14, %cst_16 {dimension_numbers = #tpu.dot_dimension_numbers<[1], [0], [0], [1], [0, 0, 1, 1], [], []>} : vector<4x64xf32>, vector<64x128xf32>, vector<4x128xf32> -> vector<4x128xf32>
    %c0_17 = arith.constant 0 : index
    %c0_18 = arith.constant 0 : index
    %16 = vector.load %arg6[%c0_17, %c0_18] : memref<4x256xf32, #tpu.memory_space<vmem>>, vector<4x256xf32>
    %c0_19 = arith.constant 0 : index
    %c0_20 = arith.constant 0 : index
    %c0_21 = arith.constant 0 : index
    %c0_22 = arith.constant 0 : index
    %17 = vector.load %arg5[%c0_19, %c0_20, %c0_21, %c0_22] : memref<3x3x4x4xf32, #tpu.memory_space<vmem>>, vector<1x1x4x4xf32>
    %18 = vector.shape_cast %17 : vector<1x1x4x4xf32> to vector<4x4xf32>
    %cst_23 = arith.constant dense<0.000000e+00> : vector<4x128xf32>
    %19 = tpu.matmul %18, %9, %cst_23 {dimension_numbers = #tpu.dot_dimension_numbers<[1], [0], [0], [1], [0, 0, 1, 1], [], []>} : vector<4x4xf32>, vector<4x128xf32>, vector<4x128xf32> -> vector<4x128xf32>
    %c0_24 = arith.constant 0 : index
    %c1_25 = arith.constant 1 : index
    %c0_26 = arith.constant 0 : index
    %c0_27 = arith.constant 0 : index
    %20 = vector.load %arg5[%c0_24, %c1_25, %c0_26, %c0_27] : memref<3x3x4x4xf32, #tpu.memory_space<vmem>>, vector<1x1x4x4xf32>
    %21 = vector.shape_cast %20 : vector<1x1x4x4xf32> to vector<4x4xf32>
    %cst_28 = arith.constant dense<0.000000e+00> : vector<4x128xf32>
    %22 = tpu.matmul %21, %12, %cst_28 {dimension_numbers = #tpu.dot_dimension_numbers<[1], [0], [0], [1], [0, 0, 1, 1], [], []>} : vector<4x4xf32>, vector<4x128xf32>, vector<4x128xf32> -> vector<4x128xf32>
    %23 = arith.addf %19, %22 : vector<4x128xf32>
    %c0_29 = arith.constant 0 : index
    %c2_30 = arith.constant 2 : index
    %c0_31 = arith.constant 0 : index
    %c0_32 = arith.constant 0 : index
    %24 = vector.load %arg5[%c0_29, %c2_30, %c0_31, %c0_32] : memref<3x3x4x4xf32, #tpu.memory_space<vmem>>, vector<1x1x4x4xf32>
    %25 = vector.shape_cast %24 : vector<1x1x4x4xf32> to vector<4x4xf32>
    %cst_33 = arith.constant dense<0.000000e+00> : vector<4x128xf32>
    %26 = tpu.matmul %25, %15, %cst_33 {dimension_numbers = #tpu.dot_dimension_numbers<[1], [0], [0], [1], [0, 0, 1, 1], [], []>} : vector<4x4xf32>, vector<4x128xf32>, vector<4x128xf32> -> vector<4x128xf32>
    %27 = arith.addf %23, %26 : vector<4x128xf32>
    %c0_34 = arith.constant 0 : index
    %c0_35 = arith.constant 0 : index
    %c0_36 = arith.constant 0 : index
    %28 = vector.load %arg4[%c0_34, %c0_35, %c0_36] : memref<3x128x256xf32, #tpu.memory_space<vmem>>, vector<1x128x256xf32>
    %29 = vector.shape_cast %28 : vector<1x128x256xf32> to vector<128x256xf32>
    %cst_37 = arith.constant dense<0.000000e+00> : vector<4x256xf32>
    %30 = tpu.matmul %27, %29, %cst_37 {dimension_numbers = #tpu.dot_dimension_numbers<[1], [0], [0], [1], [0, 0, 1, 1], [], []>} : vector<4x128xf32>, vector<128x256xf32>, vector<4x256xf32> -> vector<4x256xf32>
    %31 = arith.addf %16, %30 : vector<4x256xf32>
    %c1_38 = arith.constant 1 : index
    %c0_39 = arith.constant 0 : index
    %c0_40 = arith.constant 0 : index
    %c0_41 = arith.constant 0 : index
    %32 = vector.load %arg5[%c1_38, %c0_39, %c0_40, %c0_41] : memref<3x3x4x4xf32, #tpu.memory_space<vmem>>, vector<1x1x4x4xf32>
    %33 = vector.shape_cast %32 : vector<1x1x4x4xf32> to vector<4x4xf32>
    %cst_42 = arith.constant dense<0.000000e+00> : vector<4x128xf32>
    %34 = tpu.matmul %33, %9, %cst_42 {dimension_numbers = #tpu.dot_dimension_numbers<[1], [0], [0], [1], [0, 0, 1, 1], [], []>} : vector<4x4xf32>, vector<4x128xf32>, vector<4x128xf32> -> vector<4x128xf32>
    %c1_43 = arith.constant 1 : index
    %c1_44 = arith.constant 1 : index
    %c0_45 = arith.constant 0 : index
    %c0_46 = arith.constant 0 : index
    %35 = vector.load %arg5[%c1_43, %c1_44, %c0_45, %c0_46] : memref<3x3x4x4xf32, #tpu.memory_space<vmem>>, vector<1x1x4x4xf32>
    %36 = vector.shape_cast %35 : vector<1x1x4x4xf32> to vector<4x4xf32>
    %cst_47 = arith.constant dense<0.000000e+00> : vector<4x128xf32>
    %37 = tpu.matmul %36, %12, %cst_47 {dimension_numbers = #tpu.dot_dimension_numbers<[1], [0], [0], [1], [0, 0, 1, 1], [], []>} : vector<4x4xf32>, vector<4x128xf32>, vector<4x128xf32> -> vector<4x128xf32>
    %38 = arith.addf %34, %37 : vector<4x128xf32>
    %c1_48 = arith.constant 1 : index
    %c2_49 = arith.constant 2 : index
    %c0_50 = arith.constant 0 : index
    %c0_51 = arith.constant 0 : index
    %39 = vector.load %arg5[%c1_48, %c2_49, %c0_50, %c0_51] : memref<3x3x4x4xf32, #tpu.memory_space<vmem>>, vector<1x1x4x4xf32>
    %40 = vector.shape_cast %39 : vector<1x1x4x4xf32> to vector<4x4xf32>
    %cst_52 = arith.constant dense<0.000000e+00> : vector<4x128xf32>
    %41 = tpu.matmul %40, %15, %cst_52 {dimension_numbers = #tpu.dot_dimension_numbers<[1], [0], [0], [1], [0, 0, 1, 1], [], []>} : vector<4x4xf32>, vector<4x128xf32>, vector<4x128xf32> -> vector<4x128xf32>
    %42 = arith.addf %38, %41 : vector<4x128xf32>
    %c1_53 = arith.constant 1 : index
    %c0_54 = arith.constant 0 : index
    %c0_55 = arith.constant 0 : index
    %43 = vector.load %arg4[%c1_53, %c0_54, %c0_55] : memref<3x128x256xf32, #tpu.memory_space<vmem>>, vector<1x128x256xf32>
    %44 = vector.shape_cast %43 : vector<1x128x256xf32> to vector<128x256xf32>
    %cst_56 = arith.constant dense<0.000000e+00> : vector<4x256xf32>
    %45 = tpu.matmul %42, %44, %cst_56 {dimension_numbers = #tpu.dot_dimension_numbers<[1], [0], [0], [1], [0, 0, 1, 1], [], []>} : vector<4x128xf32>, vector<128x256xf32>, vector<4x256xf32> -> vector<4x256xf32>
    %46 = arith.addf %31, %45 : vector<4x256xf32>
    %c2_57 = arith.constant 2 : index
    %c0_58 = arith.constant 0 : index
    %c0_59 = arith.constant 0 : index
    %c0_60 = arith.constant 0 : index
    %47 = vector.load %arg5[%c2_57, %c0_58, %c0_59, %c0_60] : memref<3x3x4x4xf32, #tpu.memory_space<vmem>>, vector<1x1x4x4xf32>
    %48 = vector.shape_cast %47 : vector<1x1x4x4xf32> to vector<4x4xf32>
    %cst_61 = arith.constant dense<0.000000e+00> : vector<4x128xf32>
    %49 = tpu.matmul %48, %9, %cst_61 {dimension_numbers = #tpu.dot_dimension_numbers<[1], [0], [0], [1], [0, 0, 1, 1], [], []>} : vector<4x4xf32>, vector<4x128xf32>, vector<4x128xf32> -> vector<4x128xf32>
    %c2_62 = arith.constant 2 : index
    %c1_63 = arith.constant 1 : index
    %c0_64 = arith.constant 0 : index
    %c0_65 = arith.constant 0 : index
    %50 = vector.load %arg5[%c2_62, %c1_63, %c0_64, %c0_65] : memref<3x3x4x4xf32, #tpu.memory_space<vmem>>, vector<1x1x4x4xf32>
    %51 = vector.shape_cast %50 : vector<1x1x4x4xf32> to vector<4x4xf32>
    %cst_66 = arith.constant dense<0.000000e+00> : vector<4x128xf32>
    %52 = tpu.matmul %51, %12, %cst_66 {dimension_numbers = #tpu.dot_dimension_numbers<[1], [0], [0], [1], [0, 0, 1, 1], [], []>} : vector<4x4xf32>, vector<4x128xf32>, vector<4x128xf32> -> vector<4x128xf32>
    %53 = arith.addf %49, %52 : vector<4x128xf32>
    %c2_67 = arith.constant 2 : index
    %c2_68 = arith.constant 2 : index
    %c0_69 = arith.constant 0 : index
    %c0_70 = arith.constant 0 : index
    %54 = vector.load %arg5[%c2_67, %c2_68, %c0_69, %c0_70] : memref<3x3x4x4xf32, #tpu.memory_space<vmem>>, vector<1x1x4x4xf32>
    %55 = vector.shape_cast %54 : vector<1x1x4x4xf32> to vector<4x4xf32>
    %cst_71 = arith.constant dense<0.000000e+00> : vector<4x128xf32>
    %56 = tpu.matmul %55, %15, %cst_71 {dimension_numbers = #tpu.dot_dimension_numbers<[1], [0], [0], [1], [0, 0, 1, 1], [], []>} : vector<4x4xf32>, vector<4x128xf32>, vector<4x128xf32> -> vector<4x128xf32>
    %57 = arith.addf %53, %56 : vector<4x128xf32>
    %c2_72 = arith.constant 2 : index
    %c0_73 = arith.constant 0 : index
    %c0_74 = arith.constant 0 : index
    %58 = vector.load %arg4[%c2_72, %c0_73, %c0_74] : memref<3x128x256xf32, #tpu.memory_space<vmem>>, vector<1x128x256xf32>
    %59 = vector.shape_cast %58 : vector<1x128x256xf32> to vector<128x256xf32>
    %cst_75 = arith.constant dense<0.000000e+00> : vector<4x256xf32>
    %60 = tpu.matmul %57, %59, %cst_75 {dimension_numbers = #tpu.dot_dimension_numbers<[1], [0], [0], [1], [0, 0, 1, 1], [], []>} : vector<4x128xf32>, vector<128x256xf32>, vector<4x256xf32> -> vector<4x256xf32>
    %61 = arith.addf %46, %60 : vector<4x256xf32>
    %c0_76 = arith.constant 0 : index
    %c4 = arith.constant 4 : index
    %c0_77 = arith.constant 0 : index
    %62 = vector.load %arg7[%c0_76, %c4, %c0_77] : memref<1x8x256xf32, #tpu.memory_space<vmem>>, vector<1x4x256xf32>
    %63 = vector.shape_cast %62 : vector<1x4x256xf32> to vector<4x256xf32>
    %64 = vector.shape_cast %61 : vector<4x256xf32> to vector<1x4x256xf32>
    tpu.vector_store %arg7[%c0_76, %c4, %c0_77], %64 {strides = array<i32>} : memref<1x8x256xf32, #tpu.memory_space<vmem>>, vector<1x4x256xf32>,
    return
  }
  func.func @transform_0(%arg0: i32) -> (i32, i32, i32) {
    %c0_i32 = arith.constant 0 : i32
    %c0_i32_0 = arith.constant 0 : i32
    %c0_i32_1 = arith.constant 0 : i32
    return %arg0, %c0_i32, %c0_i32_0 : i32, i32, i32
  }
  func.func @transform_1(%arg0: i32) -> (i32, i32, i32) {
    %c0_i32 = arith.constant 0 : i32
    %c0_i32_0 = arith.constant 0 : i32
    %c0_i32_1 = arith.constant 0 : i32
    return %arg0, %c0_i32, %c0_i32_0 : i32, i32, i32
  }
  func.func @transform_2(%arg0: i32) -> (i32, i32, i32) {
    %c0_i32 = arith.constant 0 : i32
    %c0_i32_0 = arith.constant 0 : i32
    %c0_i32_1 = arith.constant 0 : i32
    %c0_i32_2 = arith.constant 0 : i32
    return %c0_i32, %c0_i32_0, %c0_i32_1 : i32, i32, i32
  }
  func.func @transform_3(%arg0: i32) -> (i32, i32, i32) {
    %c0_i32 = arith.constant 0 : i32
    %c0_i32_0 = arith.constant 0 : i32
    %c0_i32_1 = arith.constant 0 : i32
    %c0_i32_2 = arith.constant 0 : i32
    return %c0_i32, %c0_i32_0, %c0_i32_1 : i32, i32, i32
  }
  func.func @transform_4(%arg0: i32) -> (i32, i32, i32, i32) {
    %c0_i32 = arith.constant 0 : i32
    %c0_i32_0 = arith.constant 0 : i32
    %c0_i32_1 = arith.constant 0 : i32
    %c0_i32_2 = arith.constant 0 : i32
    %c0_i32_3 = arith.constant 0 : i32
    return %c0_i32, %c0_i32_0, %c0_i32_1, %c0_i32_2 : i32, i32, i32, i32
  }
  func.func @transform_5(%arg0: i32) -> (i32, i32) {
    %c0_i32 = arith.constant 0 : i32
    %c0_i32_0 = arith.constant 0 : i32
    %c0_i32_1 = arith.constant 0 : i32
    return %c0_i32, %c0_i32_0 : i32, i32
  }
  func.func @transform_6(%arg0: i32) -> (i32, i32, i32) {
    %c0_i32 = arith.constant 0 : i32
    %c0_i32_0 = arith.constant 0 : i32
    %c0_i32_1 = arith.constant 0 : i32
    return %arg0, %c0_i32, %c0_i32_0 : i32, i32, i32
  }
}

</mosaic_0001>

<bundles_post_ra>
// kernel: tpu_custom_call.1
= control target key start
LH: loop header
LB: loop body
LE: loop exit
PB: predicated region body
PF: predicated region fallthrough
CT: control target
= control target key end

     0   :  { %s2837_s0 = inlined_call_operand.hbm [shape: f32[2,4,64], index: 0, kind: input, shape index: {}]   ;;  %s2838_s1 = inlined_call_operand.hbm [shape: f32[2,4,256], index: 1, kind: input, shape index: {}]   ;;  %s2839_s2 = inlined_call_operand.hbm [shape: f32[3,64,128], index: 2, kind: input, shape index: {}]   ;;  %s2840_s3 = inlined_call_operand.hbm [shape: f32[3,128,256], index: 3, kind: input, shape index: {}]   ;;  %s2841_s4 = inlined_call_operand.hbm [shape: f32[3,3,4,4], index: 4, kind: input, shape index: {}]   ;;  %s2842_s5 = inlined_call_operand.vmem [shape: f32[4,256], index: 5, kind: input, shape index: {}]   ;;  %s2843_s6 = inlined_call_operand.hbm [shape: f32[2,8,256], index: 6, kind: output, shape index: {}]  }
   0x1   :  { %2848 = sst [smem:[#allocation17_spill]] %s2837_s0 }
   0x2   :  { %2849 = sst [smem:[#allocation18_spill]] %s2839_s2 }
   0x3   :  { %11 = vsyncpa [#allocation3], 0 }
   0x4   :  { %13 = vsyncpa [#allocation3 + $0x1], 0 }
   0x5   :  { %14 = vsyncpa [#allocation6], 0 }
   0x6   :  { %16 = vsyncpa [#allocation6 + $0x1], 0 }
   0x7   :  { %17 = vsyncpa [#allocation9], 0 }
   0x8   :  { %18 = vsyncpa [#allocation4], 0 }
   0x9   :  { %20 = vsyncpa [#allocation4 + $0x1], 0  ;;  %s2453_s21 = smov 0   ;;  %s2455_s22 = smov 0  }
   0xa   :  { %s2457_s23 = smov 0   ;;  %s2459_s24 = smov 0  }
   0xb LB: > { %s2474_s25 = sadd.s32 4294967295, %s2401_s24   ;;  %s1751_s26 = sadd.s32 4294967294, %s2401_s24   ;;  %s2401_s24 = sphi %s2459_s24, %s2873_s24   ;;  %s2397_s23 = sphi %s2457_s23, %s2872_s23   ;;  %s2393_s22 = sphi %s2455_s22, %s2871_s22   ;;  %s2389_s21 = sphi %s2453_s21, %s2870_s21  }
   0xc   : > { %p46_p0 = scmp.ne.s32.totalorder %s2393_s22, %s2389_s21  ;;  %p2844_p1 = scmp.eq.s32.totalorder %s2474_s25, 0 }
   0xd   : > { %p186_p3 = scmp.eq.s32.totalorder %s1751_s26, 1  ;;  %p1752_p5 = scmp.ge.s32.totalorder %s2401_s24, 1 }
   0xe   : > { %p2483_p4 = por %p2844_p1, %p46_p0  ;;  %p193_p7 = scmp.lt.s32.totalorder %s2401_s24, 3 }
   0xf   : > { %p2488_p6 = por %p186_p3, %p46_p0  ;;  %s2403_s30 = smov [#allocation7]  }
  0x10   : > { %s2850_s27 = scalar_select %p2483_p4, 1, 0 }
  0x11   : > { %s2851_s28 = scalar_select %p2488_p6, 1, 0 }
  0x12   : > { %p2493_p8 = pnand %p1752_p5, %p193_p7  ;;  %s205_s7 = sshll.u32 %s2403_s30, 4  ;;  %s2497_s7 = int_to_ptr.vmem [resolvable:$true] %s205_s7 }
  0x13   : > { %s2404_s9 = smov [#allocation8]   ;;  %s2854_s2 = sld [smem:[#allocation18_spill]] }
  0x14   : > { %s2852_s29 = scalar_select %p2493_p8, 1, 0 }
  0x15   : > { %p2105_p9 = pneg %p2493_p8  ;;  %s218_s10 = sshll.u32 %s2404_s9, 4  ;;  %s2508_s10 = int_to_ptr.vmem [resolvable:$true] %s218_s10 }
  0x17   : > { %p2504_p11 = pnand %p2105_p9, %p2844_p1 }
  0x19   : > { %s2179_s13 = scalar_lea.hbm %s2854_s2, 3072  ;;  %p2518_p13 = pneg %p2504_p11 }
  0x1a   : > { %p2180_p12 = scmp.ne.s32.totalorder %s2854_s2, %s2179_s13  ;;  %p2186_p5 = scmp.lt.u32.totalorder %s2179_s13, %s2854_s2 }
  0x1c   : > { %p2182_p0 = pnand %p2518_p13, %p2180_p12 }
  0x1e   : > { %p2183_p3 = pneg %p2182_p0 }
  0x20   : > { %p2188_p7 = pnand %p2186_p5, %p2183_p3 }
  0x22   : > { %2191 = shalt.err (!%p2188_p7)
}
  0x23   : > { %s2192_s19 = scalar_lea.vmem %s2497_s7, 3072  ;;  %p2200_p2 = scmp.lt.s32.totalorder %s2497_s7, %s2497_s7 }
  0x24   : > { %p2193_p9 = scmp.ne.s32.totalorder %s2497_s7, %s2192_s19  ;;  %p2201_p6 = scmp.lt.s32.totalorder %s2192_s19, %s2192_s19 }
  0x26   : > { %p2195_p10 = pnand %p2193_p9, %p2518_p13  ;;  %p2202_p12 = por %p2201_p6, %p2200_p2 }
  0x28   : > { %p2196_p1 = pneg %p2195_p10 }
  0x2a   : > { %p2203_p0 = pnand %p2202_p12, %p2196_p1 }
  0x2c   : > { %2206 = shalt.err (!%p2203_p0)
}
  0x2d   : > { %s2405_s20 = smov 128   ;;  %s2406_s26 = smov 8  }
  0x2e   : > { %2108 = dma.hbm_to_vmem [thread:$0]  (!%p2504_p11), %s2854_s2, 3072, %s2497_s7, [#allocation6], %s2405_s20, %s2405_s20, %s2406_s26  }
  0x2f   : > { %s2207_s13 = scalar_lea.hbm %s2840_s3, 12288 }
  0x30   : > { %p2208_p2 = scmp.ne.s32.totalorder %s2840_s3, %s2207_s13  ;;  %p2214_p10 = scmp.lt.u32.totalorder %s2207_s13, %s2840_s3 }
  0x32   : > { %p2210_p1 = pnand %p2208_p2, %p2518_p13 }
  0x34   : > { %p2211_p6 = pneg %p2210_p1 }
  0x36   : > { %p2216_p3 = pnand %p2214_p10, %p2211_p6 }
  0x38   : > { %2219 = shalt.err (!%p2216_p3)
}
  0x39   : > { %s2220_s7 = scalar_lea.vmem %s2508_s10, 12288  ;;  %p2228_p12 = scmp.lt.s32.totalorder %s2508_s10, %s2508_s10 }
  0x3a   : > { %p2221_p5 = scmp.ne.s32.totalorder %s2508_s10, %s2220_s7  ;;  %p2229_p0 = scmp.lt.s32.totalorder %s2220_s7, %s2220_s7 }
  0x3c   : > { %p2223_p7 = pnand %p2221_p5, %p2518_p13  ;;  %p2230_p2 = por %p2229_p0, %p2228_p12 }
  0x3e   : > { %p2224_p9 = pneg %p2223_p7 }
  0x40   : > { %p2231_p1 = pnand %p2230_p2, %p2224_p9 }
  0x42   : > { %2234 = shalt.err (!%p2231_p1)
}
  0x43   : > { %s2407_s19 = smov 256   ;;  %s2408_s20 = smov 16  }
  0x44   : > { %2111 = dma.hbm_to_vmem [thread:$0]  (!%p2504_p11), %s2840_s3, 12288, %s2508_s10, [#allocation9], %s2407_s19, %s2407_s19, %s2408_s20  }
  0x45   : > { %s2409_s9 = smov [#allocation10]   ;;  %s2235_s14 = scalar_lea.hbm %s2841_s4, 576 }
  0x46   : > { %s231_s11 = sshll.u32 %s2409_s9, 4  ;;  %p2236_p6 = scmp.ne.s32.totalorder %s2841_s4, %s2235_s14  ;;  %s232_s11 = int_to_ptr.vmem [resolvable:$true] %s231_s11 }
  0x47   : > { %p2242_p5 = scmp.lt.u32.totalorder %s2235_s14, %s2841_s4 }
  0x48   : > { %p2238_p10 = pnand %p2236_p6, %p2518_p13 }
  0x4a   : > { %p2239_p3 = pneg %p2238_p10 }
  0x4c   : > { %p2244_p7 = pnand %p2242_p5, %p2239_p3 }
  0x4e   : > { %2247 = shalt.err (!%p2244_p7)
}
  0x4f   : > { %s2248_s10 = scalar_lea.vmem %s232_s11, 576  ;;  %p2256_p2 = scmp.lt.s32.totalorder %s232_s11, %s232_s11 }
  0x50   : > { %p2249_p9 = scmp.ne.s32.totalorder %s232_s11, %s2248_s10  ;;  %p2257_p1 = scmp.lt.s32.totalorder %s2248_s10, %s2248_s10 }
  0x52   : > { %p2251_p12 = pnand %p2249_p9, %p2518_p13  ;;  %p2258_p4 = por %p2257_p1, %p2256_p2 }
  0x54   : > { %p2252_p0 = pneg %p2251_p12 }
  0x56   : > { %p2259_p8 = pnand %p2258_p4, %p2252_p0 }
  0x58   : > { %2262 = shalt.err (!%p2259_p8)
}
  0x59   : > { %s2410_s19 = smov 64   ;;  %s2411_s16 = smov 4  }
  0x5a   : > { %2114 = dma.hbm_to_vmem [thread:$0]  (!%p2504_p11), %s2841_s4, 576, %s232_s11, [#allocation9], %s2410_s19, %s2410_s19, %s2411_s16  }
  0x5b   : > { %s2581_s30 = sadd.s32 1, %s2401_s24   ;;  %s33_s12 = sadd.s32 1, %s2397_s23 }
  0x5c   : > { %s30_s9 = ssub.s32 %s2401_s24, %s2581_s30  ;;  %p40_p8 = scmp.ne.s32.totalorder %s2397_s23, %s2393_s22 }
  0x5d   : > { %p31_p4 = scmp.eq.s32.totalorder %s30_s9, 0  ;;  %p41_p13 = scmp.eq.s32.totalorder %s2401_s24, 0 }
  0x5e   : > { %p2129_p6 = scmp.lt.s32.totalorder %s2401_s24, 2  ;;  %p2856_p3 = scmp.eq.s32.totalorder %s2474_s25, 1 }
  0x5f   : > { %s2591_s13 = scalar_select %p31_p4, %s2397_s23, %s33_s12  }
  0x60   : > { %p42_p10 = por %p41_p13, %p40_p8  ;;  %p2595_p5 = por %p2856_p3, %p40_p8 }
  0x61   : > { %s2600_s14 = sand.u32 1, %s2397_s23   ;;  %s1758_s11 = sshll.u32 %s2401_s24, 6 }
  0x62   : > { %s2857_s8 = scalar_select %p2595_p5, 1, 0 }
  0x63   : > { %s1757_s15 = sshll.u32 %s2600_s14, 2  ;;  %s2858_s0 = sld [smem:[#allocation17_spill]] }
  0x64   : > { %s252_s10 = scalar_lea.vmem [#allocation2], %s1757_s15  ;;  %p2609_p11 = pnand %p2129_p6, %p42_p10 }
  0x65   : > { %s259_s19 = sshll.u32 %s252_s10, 4  ;;  %s249_s26 = scalar_lea.sflag [#allocation3], %s2600_s14  ;;  %s2613_s19 = int_to_ptr.vmem [resolvable:$true] %s259_s19 }
  0x66   : > { %p2265_p9 = pneg %p2609_p11 }
  0x69   : > { %s2607_s7 = scalar_lea.hbm %s2858_s0, %s1758_s11  ;;  %s2268_s15 = scalar_lea.hbm %s2858_s0, 128 }
  0x6a   : > { %s2263_s9 = scalar_lea.hbm %s2607_s7, 64  ;;  %p2269_p2 = scmp.lt.u32.totalorder %s2607_s7, %s2858_s0 }
  0x6b   : > { %p2264_p7 = scmp.ne.s32.totalorder %s2607_s7, %s2263_s9  ;;  %p2270_p1 = scmp.lt.u32.totalorder %s2268_s15, %s2263_s9 }
  0x6c   : > { %p2272_p8 = scmp.lt.u32.totalorder %s2263_s9, %s2607_s7 }
  0x6d   : > { %p2266_p12 = pnand %p2265_p9, %p2264_p7  ;;  %p2271_p4 = por %p2270_p1, %p2269_p2 }
  0x6f   : > { %p2267_p0 = pneg %p2266_p12  ;;  %p2273_p13 = por %p2272_p8, %p2271_p4 }
  0x71   : > { %p2274_p6 = pnand %p2273_p13, %p2267_p0 }
  0x73   : > { %2277 = shalt.err (!%p2274_p6)
}
  0x74   : > { %s2278_s10 = scalar_lea.vmem %s2613_s19, 64  ;;  %s2412_s12 = smov [#allocation2]  }
  0x75   : > { %p2279_p10 = scmp.ne.s32.totalorder %s2613_s19, %s2278_s10  ;;  %s2283_s11 = sshll.u32 %s2412_s12, 4  ;;  %s2284_s11 = int_to_ptr.vmem [resolvable:$false] %s2283_s11 }
  0x76   : > { %s2285_s17 = scalar_lea.vmem %s2284_s11, 128  ;;  %p2286_p12 = scmp.lt.s32.totalorder %s2613_s19, %s2284_s11 }
  0x77   : > { %p2281_p3 = pnand %p2279_p10, %p2265_p9  ;;  %p2287_p2 = scmp.lt.s32.totalorder %s2285_s17, %s2278_s10 }
  0x79   : > { %p2282_p7 = pneg %p2281_p3  ;;  %p2288_p1 = por %p2287_p2, %p2286_p12 }
  0x7b   : > { %p2289_p4 = pnand %p2288_p1, %p2282_p7 }
  0x7d   : > { %2292 = shalt.err (!%p2289_p4)
}
  0x7e   : > { %2118 = dma.hbm_to_vmem [thread:$0]  (!%p2609_p11), %s2607_s7, 64, %s2613_s19, %s249_s26  }
  0x7f   : > { %s1759_s9 = sshll.u32 %s2600_s14, 3  ;;  %s1795_s15 = sshll.u32 %s2401_s24, 7 }
  0x80   : > { %s2647_s20 = scalar_lea.hbm %s2838_s1, %s1795_s15  ;;  %s270_s10 = scalar_lea.vmem [#allocation5], %s1759_s9 }
  0x81   : > { %s278_s11 = sshll.u32 %s270_s10, 4  ;;  %s2860_s17 = sand.u32 1, %s2401_s24   ;;  %s279_s11 = int_to_ptr.vmem [resolvable:$true] %s278_s11 }
  0x82   : > { %s267_s0 = scalar_lea.sflag [#allocation6], %s2860_s17  ;;  %s2293_s2 = scalar_lea.hbm %s2647_s20, 128 }
  0x83   : > { %p2294_p0 = scmp.ne.s32.totalorder %s2647_s20, %s2293_s2  ;;  %s2298_s19 = scalar_lea.hbm %s2838_s1, 256 }
  0x84   : > { %p2299_p6 = scmp.lt.u32.totalorder %s2647_s20, %s2838_s1  ;;  %p2300_p10 = scmp.lt.u32.totalorder %s2298_s19, %s2293_s2 }
  0x85   : > { %p2296_p8 = pnand %p2294_p0, %p2265_p9  ;;  %p2302_p7 = scmp.lt.u32.totalorder %s2293_s2, %s2647_s20 }
  0x86   : > { %p2301_p3 = por %p2300_p10, %p2299_p6 }
  0x87   : > { %p2297_p13 = pneg %p2296_p8 }
  0x88   : > { %p2303_p12 = por %p2302_p7, %p2301_p3 }
  0x8a   : > { %p2304_p2 = pnand %p2303_p12, %p2297_p13 }
  0x8c   : > { %2307 = shalt.err (!%p2304_p2)
}
  0x8d   : > { %s2308_s9 = scalar_lea.vmem %s279_s11, 128  ;;  %s2413_s18 = smov [#allocation5]  }
  0x8e   : > { %p2309_p1 = scmp.ne.s32.totalorder %s279_s11, %s2308_s9  ;;  %s2313_s12 = sshll.u32 %s2413_s18, 4  ;;  %s2314_s12 = int_to_ptr.vmem [resolvable:$false] %s2313_s12 }
  0x8f   : > { %s2315_s10 = scalar_lea.vmem %s2314_s12, 256  ;;  %p2316_p8 = scmp.lt.s32.totalorder %s279_s11, %s2314_s12 }
  0x90   : > { %p2311_p4 = pnand %p2309_p1, %p2265_p9  ;;  %p2317_p5 = scmp.lt.s32.totalorder %s2315_s10, %s2308_s9 }
  0x92   : > { %p2312_p0 = pneg %p2311_p4  ;;  %p2318_p6 = por %p2317_p5, %p2316_p8 }
  0x94   : > { %p2319_p10 = pnand %p2318_p6, %p2312_p0 }
  0x96   : > { %2322 = shalt.err (!%p2319_p10)
}
  0x97   : > { %2121 = dma.hbm_to_vmem [thread:$0]  (!%p2609_p11), %s2647_s20, 128, %s279_s11, %s267_s0  }
  0x98   : > { %p2861_p13 = scmp.ne.s32.totalorder %s2852_s29, 0 }
  0x99   : > { %s2673_s2 = sand.u32 (!%p2861_p13), 1, %s2393_s22   ;;  %p2862_p5 = scmp.ne.s32.totalorder (!%p2861_p13), %s2850_s27, 0 }
  0x9a   : > { %287 = sbr.rel (%p2861_p13) target bundleno = 1116 (0x45c), region = 44  ;;  %s1763_s17 = sshll.u32 (!%p2861_p13), %s2673_s2, 2 }
  0x9b   : > { %s290_s14 = scalar_lea.sflag (!%p2861_p13), [#allocation3], %s2673_s2  ;;  %s2677_s7 = scalar_lea.vmem (!%p2861_p13), [#allocation2], %s1763_s17 }
  0xa1   : > { %2368 = dma.done.wait (%p2862_p5), %s290_s14, 64  }
  0xa2   : > { %2370 = vsyncadd (%p2862_p5), %s290_s14, 4294967232  ;;  %s298_s0 = sand.u32 1, %s2474_s25   ;;  %s1764_s29 = sshll.u32 %s2673_s2, 3 }
  0xa3   : > { %s299_s16 = scalar_lea.sflag [#allocation6], %s298_s0  ;;  %s2685_s20 = scalar_lea.vmem [#allocation5], %s1764_s29 }
  0xa4   : > { %2372 = dma.done.wait (%p2862_p5), %s299_s16, 128  }
  0xa5   : > { %2374 = vsyncadd (%p2862_p5), %s299_s16, 4294967168  ;;  %p2863_p11 = scmp.eq.s32.totalorder %s2474_s25, 0 }
  0xa7   : > { %2376 = dma.done.wait (%p2863_p11), [#allocation6], 3072   ;;  %p2864_p9 = pmov %p2863_p11 }
  0xa9   : > { %2378 = vsyncadd (%p2864_p9), [#allocation6], 4294964224  ;;  %p2865_p3 = pmov %p2864_p9 }
  0xab   : > { %2380 = dma.done.wait (%p2865_p3), [#allocation9], 12864   ;;  %p2866_p7 = pmov %p2865_p3 }
  0xac   : > { %v2414_v0 = vmov 0.0|0.0   ;;  %vm2415_vm0 = vmmov 0   ;;  %v2416_v1 = vmov 0.0   ;;  %v355_v2 = vld [vmem:[#allocation7] sm:$0xff]  ;;  %v356_v3 = vld [vmem:[#allocation7 + $0x8] sm:$0xff]  ;;  %v357_v4 = vld [vmem:[#allocation7 + $0x10] sm:$0xff] }
  0xad   : > { %2382 = vsyncadd (%p2866_p7), [#allocation9], 4294954432  ;;  %1944 = vmatprep.subr.bf16.mxu0 %v2414_v0  ;;  %1858 = vmatprep.mubr.msk.f32.mxu0 %vm2415_vm0, %v2416_v1  ;;  %v1945_v5 = vpack.c.bf16 %v356_v3, %v355_v2  ;;  %v358_v6 = vld [vmem:[#allocation7 + $0x18] sm:$0xff]  ;;  %v359_v8 = vld [vmem:[#allocation7 + $0x20] sm:$0xff]  ;;  %vm363_vm1 = vcmask 523264   ;;  %vm603_vm2 = vcmask 1043456  }
  0xae   : > { %1899 = vmatprep.subr.mxu1 %v2416_v1  ;;  %1901 = vmatprep.mubr.msk.f32.mxu1 %vm2415_vm0, %v2416_v1  ;;  %v1948_v7 = vpack.c.bf16 %v358_v6, %v357_v4  ;;  %v360_v9 = vld [vmem:[#allocation7 + $0x28] sm:$0xff]  ;;  %v361_v11 = vld [vmem:[#allocation7 + $0x30] sm:$0xff]  ;;  %v362_v12 = vld [vmem:[#allocation7 + $0x38] sm:$0xff]  ;;  %vm599_vm3 = vcmask 31744   ;;  %s1768_s27 = sshll.u32 %s2673_s2, 4  ;;  %s1796_s15 = sshll.u32 %s2474_s25, 8 }
  0xaf   : > { %1946 = vmatpush3.bf16.msra.mxu0 %v1945_v5  ;;  %v1951_v10 = vpack.c.bf16 %v360_v9, %v359_v8  ;;  %v1954_v13 = vpack.c.bf16 %v362_v12, %v361_v11  ;;  %v438_v14 = vld [vmem:[#allocation7 + $0x40] sm:$0xff]  ;;  %v439_v15 = vld [vmem:[#allocation7 + $0x48] sm:$0xff]  ;;  %v440_v18 = vld [vmem:[#allocation7 + $0x50] sm:$0xff]  ;;  %s347_s11 = scalar_lea.vmem [#allocation11], %s1768_s27  ;;  %s2793_s10 = scalar_lea.hbm %s2843_s6, %s1796_s15 }
  0xb0   : > { %1947 = vmatprep.subr.bf16.mxu0 %v2414_v0  ;;  %v354_v16 = vld [vmem:[%s2677_s7] sm:$0xf]  ;;  %v1957_v17 = vpack.c.bf16 %v439_v15, %v438_v14  ;;  %v441_v19 = vld [vmem:[#allocation7 + $0x58] sm:$0xff]  ;;  %v442_v21 = vld [vmem:[#allocation7 + $0x60] sm:$0xff]  ;;  %s1630_s9 = sshll.u32 %s347_s11, 4  ;;  %s1616_s17 = scalar_lea.sflag [#allocation4], %s2673_s2  ;;  %s2795_s9 = int_to_ptr.vmem [resolvable:$true] %s1630_s9 }
  0xb1   : > { %v1960_v20 = vpack.c.bf16 %v441_v19, %v440_v18  ;;  %v443_v22 = vld [vmem:[#allocation7 + $0x68] sm:$0xff]  ;;  %v444_v24 = vld [vmem:[#allocation7 + $0x70] sm:$0xff]  ;;  %v445_v25 = vld [vmem:[#allocation7 + $0x78] sm:$0xff]  ;;  %s2323_s14 = scalar_lea.vmem %s2795_s9, 256  ;;  %p2867_p2 = scmp.ne.s32.totalorder %s2857_s8, 0 }
  0xb2   : > { %v1963_v23 = vpack.c.bf16 %v443_v22, %v442_v21  ;;  %v1966_v26 = vpack.c.bf16 %v445_v25, %v444_v24  ;;  %v517_v27 = vld [vmem:[#allocation7 + $0x80] sm:$0xff]  ;;  %v518_v28 = vld [vmem:[#allocation7 + $0x88] sm:$0xff]  ;;  %v519_v30 = vld [vmem:[#allocation7 + $0x90] sm:$0xff]  ;;  %p2324_p12 = scmp.ne.s32.totalorder %s2795_s9, %s2323_s14  ;;  %s2417_s25 = smov [#allocation11]  }
  0xb3   : > { %1949 = vmatpush3.bf16.msra.mxu0 %v1948_v7  ;;  %v1969_v29 = vpack.c.bf16 %v518_v28, %v517_v27  ;;  %v520_v31 = vld [vmem:[#allocation7 + $0x98] sm:$0xff]  ;;  %v521_v33 = vld [vmem:[#allocation7 + $0xa0] sm:$0xff]  ;;  %v522_v34 = vld [vmem:[#allocation7 + $0xa8] sm:$0xff]  ;;  %s2327_s7 = sshll.u32 %s2417_s25, 4  ;;  %s2328_s7 = int_to_ptr.vmem [resolvable:$false] %s2327_s7 }
  0xb4   : > { %1950 = vmatprep.subr.bf16.mxu0 %v2414_v0  ;;  %v1972_v32 = vpack.c.bf16 %v520_v31, %v519_v30  ;;  %v1975_v35 = vpack.c.bf16 %v522_v34, %v521_v33  ;;  %v523_v36 = vld [vmem:[#allocation7 + $0xb0] sm:$0xff]  ;;  %v524_v37 = vld [vmem:[#allocation7 + $0xb8] sm:$0xff]  ;;  %v941_v39 = vld [vmem:[#allocation10 + $0xc] sm:$0xf]  ;;  %p2325_p1 = pnand %p2324_p12, %p2867_p2  ;;  %s2329_s0 = scalar_lea.vmem %s2328_s7, 512 }
  0xb5   : > { %v1978_v38 = vpack.c.bf16 %v524_v37, %v523_v36  ;;  %v598_v42 = vld [vmem:[#allocation10 + $0x4] sm:$0xf]  ;;  %v596_v45 = vld [vmem:[#allocation10] sm:$0xf]  ;;  %v833_v46 = vld [vmem:[#allocation8 + $0x8] sm:$0xff]  ;;  %p2330_p0 = scmp.lt.s32.totalorder %s2795_s9, %s2328_s7  ;;  %p2331_p8 = scmp.lt.s32.totalorder %s2329_s0, %s2323_s14 }
  0xb6   : > { %v835_v47 = vld [vmem:[#allocation8 + $0x18] sm:$0xff]  ;;  %v832_v48 = vld [vmem:[#allocation8] sm:$0xff]  ;;  %v834_v49 = vld [vmem:[#allocation8 + $0x10] sm:$0xff]  ;;  %p2326_p4 = pneg %p2325_p1 }
  0xb7   : > { %1952 = vmatpush3.bf16.msra.mxu0 %v1951_v10  ;;  %v837_v50 = vld [vmem:[#allocation8 + $0x28] sm:$0xff]  ;;  %v839_v51 = vld [vmem:[#allocation8 + $0x38] sm:$0xff]  ;;  %v1980_v52 = vpack.c.bf16 %v835_v47, %v833_v46  ;;  %v1982_v54 = vpack.c.bf16 %v834_v49, %v832_v48  ;;  %v836_v57 = vld [vmem:[#allocation8 + $0x20] sm:$0xff]  ;;  %p2332_p6 = por %p2331_p8, %p2330_p0 }
  0xb8   : > { %1953 = vmatprep.subr.bf16.mxu0 %v2414_v0  ;;  %v754_v53 = vld [vmem:[#allocation10 + $0x8] sm:$0xf]  ;;  %v1984_v56 = vpack.c.bf16 %v839_v51, %v837_v50  ;;  %v838_v58 = vld [vmem:[#allocation8 + $0x30] sm:$0xff]  ;;  %v843_v61 = vld [vmem:[#allocation8 + $0x58] sm:$0xff] }
  0xb9   : > { %v841_v60 = vld [vmem:[#allocation8 + $0x48] sm:$0xff]  ;;  %v1986_v62 = vpack.c.bf16 %v838_v58, %v836_v57  ;;  %v842_v2 = vld [vmem:[#allocation8 + $0x50] sm:$0xff]  ;;  %v847_v4 = vld [vmem:[#allocation8 + $0x78] sm:$0xff]  ;;  %p2333_p10 = pnand %p2332_p6, %p2326_p4 }
  0xba   : > { %v1988_v63 = vpack.c.bf16 %v843_v61, %v841_v60  ;;  %v845_v3 = vld [vmem:[#allocation8 + $0x68] sm:$0xff]  ;;  %v844_v7 = vld [vmem:[#allocation8 + $0x60] sm:$0xff]  ;;  %v846_v8 = vld [vmem:[#allocation8 + $0x70] sm:$0xff] }
  0xbb   : > { %1955 = vmatpush3.bf16.msra.mxu0 %v1954_v13  ;;  %v1992_v6 = vpack.c.bf16 %v847_v4, %v845_v3  ;;  %v849_v9 = vld [vmem:[#allocation8 + $0x88] sm:$0xff]  ;;  %v851_v10 = vld [vmem:[#allocation8 + $0x98] sm:$0xff]  ;;  %v1994_v11 = vpack.c.bf16 %v846_v8, %v844_v7  ;;  %v848_v13 = vld [vmem:[#allocation8 + $0x80] sm:$0xff] }
  0xbc   : > { %1956 = vmatprep.subr.bf16.mxu0 %v2414_v0  ;;  %v1996_v12 = vpack.c.bf16 %v851_v10, %v849_v9  ;;  %v850_v14 = vld [vmem:[#allocation8 + $0x90] sm:$0xff]  ;;  %v853_v15 = vld [vmem:[#allocation8 + $0xa8] sm:$0xff]  ;;  %v852_v19 = vld [vmem:[#allocation8 + $0xa0] sm:$0xff] }
  0xbd   : > { %v857_v21 = vld [vmem:[#allocation8 + $0xc8] sm:$0xff]  ;;  %v859_v22 = vld [vmem:[#allocation8 + $0xd8] sm:$0xff]  ;;  %v856_v25 = vld [vmem:[#allocation8 + $0xc0] sm:$0xff] }
  0xbe   : > { %1859 = vmatmul.mubr.msk.f32.vlgmr.msra.gmra.mrb[0].mxu0 %vm363_vm1, %v354_v16  ;;  %v2004_v24 = vpack.c.bf16 %v859_v22, %v857_v21  ;;  %v861_v27 = vld [vmem:[#allocation8 + $0xe8] sm:$0xff]  ;;  %v863_v28 = vld [vmem:[#allocation8 + $0xf8] sm:$0xff]  ;;  %v860_v31 = vld [vmem:[#allocation8 + $0xe0] sm:$0xff] }
  0xbf   : > { %1958 = vmatpush3.bf16.msra.mxu0 %v1957_v17  ;;  %1877 = vmatprep.mubr.msk.f32.mxu0 %vm2415_vm0, %v2416_v1  ;;  %v1998_v17 = vpack.c.bf16 %v850_v14, %v848_v13  ;;  %v2008_v30 = vpack.c.bf16 %v863_v28, %v861_v27  ;;  %v1091_v34 = vld [vmem:[#allocation10 + $0x14] sm:$0xf]  ;;  %v1170_v36 = vld [vmem:[#allocation8 + $0x118] sm:$0xff]  ;;  %v1167_v37 = vld [vmem:[#allocation8 + $0x100] sm:$0xff] }
  0xc0   : > { %1959 = vmatprep.subr.bf16.mxu0 %v2414_v0  ;;  %v1171_v46 = vld [vmem:[#allocation8 + $0x120] sm:$0xff]  ;;  %v1173_v47 = vld [vmem:[#allocation8 + $0x130] sm:$0xff]  ;;  %v1176_v48 = vld [vmem:[#allocation8 + $0x148] sm:$0xff] }
  0xc1   : > { %v1178_v49 = vld [vmem:[#allocation8 + $0x158] sm:$0xff]  ;;  %v2018_v50 = vpack.c.bf16 %v1173_v47, %v1171_v46  ;;  %v1181_v60 = vld [vmem:[#allocation8 + $0x170] sm:$0xff]  ;;  %v1184_v61 = vld [vmem:[#allocation8 + $0x188] sm:$0xff] }
  0xc2   : > { %v2020_v51 = vpack.c.bf16 %v1178_v49, %v1176_v48  ;;  %v1185_v3 = vld [vmem:[#allocation8 + $0x190] sm:$0xff]  ;;  %v1188_v4 = vld [vmem:[#allocation8 + $0x1a8] sm:$0xff]  ;;  %v1187_v8 = vld [vmem:[#allocation8 + $0x1a0] sm:$0xff] }
  0xc3   : > { %1961 = vmatpush3.bf16.msra.mxu0 %v1960_v20  ;;  %v854_v20 = vld [vmem:[#allocation8 + $0xb0] sm:$0xff]  ;;  %v1192_v10 = vld [vmem:[#allocation8 + $0x1c8] sm:$0xff]  ;;  %v1502_v21 = vld [vmem:[#allocation8 + $0x200] sm:$0xff] }
  0xc4   : > { %1962 = vmatprep.subr.bf16.mxu0 %v2414_v0  ;;  %v1189_v9 = vld [vmem:[#allocation8 + $0x1b0] sm:$0xff]  ;;  %v1507_v22 = vld [vmem:[#allocation8 + $0x228] sm:$0xff]  ;;  %v1506_v27 = vld [vmem:[#allocation8 + $0x220] sm:$0xff] }
  0xc5   : > { %v1508_v28 = vld [vmem:[#allocation8 + $0x230] sm:$0xff]  ;;  %v1517_v46 = vld [vmem:[#allocation8 + $0x278] sm:$0xff]  ;;  %v1514_v48 = vld [vmem:[#allocation8 + $0x260] sm:$0xff] }
  0xc6   : > { %v1516_v49 = vld [vmem:[#allocation8 + $0x270] sm:$0xff] }
  0xc7   : > { %1964 = vmatpush3.bf16.msra.mxu0 %v1963_v23  ;;  %v2002_v23 = vpack.c.bf16 %v854_v20, %v852_v19  ;;  %v1505_v19 = vld [vmem:[#allocation8 + $0x218] sm:$0xff] }
  0xc8   : > { %1965 = vmatprep.subr.bf16.mxu0 %v2414_v0  ;;  %v1276_v20 = vld [vmem:[#allocation10 + $0x18] sm:$0xf] }
  0xcb   : > { %1967 = vmatpush3.bf16.msra.mxu0 %v1966_v26  ;;  %v858_v26 = vld [vmem:[#allocation8 + $0xd0] sm:$0xff] }
  0xcc   : > { %1968 = vmatprep.subr.bf16.mxu0 %v2414_v0 }
  0xce   : > { %1878 = vmatmul.mubr.msk.f32.vlgmr.msra.gmra.mrb[2].mxu0 %vm363_vm1, %v354_v16 }
  0xcf   : > { %1970 = vmatpush3.bf16.msra.mxu0 %v1969_v29  ;;  %1896 = vmatprep.mubr.msk.f32.mxu0 %vm2415_vm0, %v2416_v1  ;;  %v2006_v29 = vpack.c.bf16 %v858_v26, %v856_v25 }
  0xd0   : > { %1971 = vmatprep.subr.bf16.mxu0 %v2414_v0 }
  0xd3   : > { %1973 = vmatpush3.bf16.msra.mxu0 %v1972_v32  ;;  %v862_v32 = vld [vmem:[#allocation8 + $0xf0] sm:$0xff] }
  0xd4   : > { %1974 = vmatprep.subr.bf16.mxu0 %v2414_v0  ;;  %v2010_v33 = vpack.c.bf16 %v862_v32, %v860_v31  ;;  %v1511_v32 = vld [vmem:[#allocation8 + $0x248] sm:$0xff] }
  0xd7   : > { %1976 = vmatpush3.bf16.msra.mxu0 %v1975_v35  ;;  %v1168_v35 = vld [vmem:[#allocation8 + $0x108] sm:$0xff] }
  0xd8   : > { %1977 = vmatprep.subr.bf16.mxu0 %v2414_v0  ;;  %v840_v0 = vld [vmem:[#allocation8 + $0x40] sm:$0xff] }
  0xd9   : > { %v1990_v5 = vpack.c.bf16 %v842_v2, %v840_v0  ;;  %v1183_v2 = vld [vmem:[#allocation8 + $0x180] sm:$0xff] }
  0xdb   : > { %1979 = vmatpush3.bf16.msra.mxu0 %v1978_v38  ;;  %v2012_v38 = vpack.c.bf16 %v1170_v36, %v1168_v35  ;;  %v1510_v35 = vld [vmem:[#allocation8 + $0x240] sm:$0xff]  ;;  %v1512_v36 = vld [vmem:[#allocation8 + $0x250] sm:$0xff] }
  0xdc   : > { %1919 = vmatprep.subr.mxu0 %v2416_v1 }
  0xde   : > { %1897 = vmatmul.mubr.msk.f32.vlgmr.msra.gmra.mrb[4].mxu0 %vm363_vm1, %v354_v16  ;;  %v855_v16 = vld [vmem:[#allocation8 + $0xb8] sm:$0xff] }
  0xdf   : > { %1921 = vmatprep.mubr.msk.f32.mxu0 %vm2415_vm0, %v2416_v1  ;;  %v2000_v18 = vpack.c.bf16 %v855_v16, %v853_v15  ;;  %v943_v16 = vld [vmem:[#allocation10 + $0x10] sm:$0xf] }
 0x191   : > { %v2727_v40 = vpop.f32.mrb[0].mxu0 }
 0x192   : > { %v1860_v41 = vpop.f32.mrb[1].mxu0  ;;  %1920 = vmatpush3.msk.msra.mxu0 %vm603_vm2, %v2727_v40 }
 0x193   : > { %1924 = vmatprep.subr.mxu0 %v2416_v1  ;;  %1922 = vmatmul.mubr.msk.f32.vlgmr.msra.gmra.mrb[6].mxu0 %vm599_vm3, %v941_v39  ;;  %v1169_v39 = vld [vmem:[#allocation8 + $0x110] sm:$0xff]  ;;  %v1172_v41 = vld [vmem:[#allocation8 + $0x128] sm:$0xff] }
 0x194   : > { %1926 = vmatprep.mubr.msk.f32.mxu0 %vm2415_vm0, %v2416_v1 }
 0x1a1   : > { %v2735_v43 = vpop.f32.mrb[2].mxu0 }
 0x1a2   : > { %v1879_v44 = vpop.f32.mrb[3].mxu0  ;;  %1900 = vmatpush3.msk.msra.mxu1 %vm603_vm2, %v2735_v43 }
 0x1a3   : > { %1902 = vmatmul.mubr.msk.f32.vlgmr.msra.gmra.mrb[0].mxu1 %vm599_vm3, %v598_v42  ;;  %1904 = vmatprep.subr.mxu1 %v2416_v1  ;;  %v1174_v42 = vld [vmem:[#allocation8 + $0x138] sm:$0xff]  ;;  %v2014_v44 = vpack.c.bf16 %v1169_v39, %v1167_v37  ;;  %v2054_v37 = vpack.c.bf16 %v1512_v36, %v1510_v35 }
 0x1a4   : > { %1905 = vmatpush3.msk.msra.mxu1 %vm603_vm2, %v2727_v40  ;;  %1906 = vmatprep.mubr.msk.f32.mxu1 %vm2415_vm0, %v2416_v1  ;;  %v1198_v39 = vld [vmem:[#allocation8 + $0x1f8] sm:$0xff] }
 0x1a5   : > { %1909 = vmatprep.subr.mxu1 %v2416_v1 }
 0x1ab   : > { %1907 = vmatmul.mubr.msk.f32.vlgmr.msra.gmra.mrb[0].mxu1 %vm599_vm3, %v596_v45  ;;  %v2016_v45 = vpack.c.bf16 %v1174_v42, %v1172_v41  ;;  %v1195_v42 = vld [vmem:[#allocation8 + $0x1e0] sm:$0xff] }
 0x1ac   : > { %1911 = vmatprep.mubr.msk.f32.mxu1 %vm2415_vm0, %v2416_v1 }
 0x1b1   : > { %v2749_v55 = vpop.f32.mrb[4].mxu0 }
 0x1b2   : > { %v1898_v59 = vpop.f32.mrb[5].mxu0  ;;  %1910 = vmatpush3.msk.msra.mxu1 %vm603_vm2, %v2749_v55  ;;  %1925 = vmatpush3.msk.msra.mxu0 %vm603_vm2, %v2749_v55 }
 0x1b3   : > { %1912 = vmatmul.mubr.msk.f32.vlgmr.msra.gmra.mrb[0].mxu1 %vm599_vm3, %v754_v53  ;;  %1981 = vmatprep.subr.bf16.mxu1 %v1980_v52  ;;  %v1175_v52 = vld [vmem:[#allocation8 + $0x140] sm:$0xff]  ;;  %v1177_v53 = vld [vmem:[#allocation8 + $0x150] sm:$0xff] }
 0x1b4   : > { %1983 = vmatpush1.bf16.msra.mxu1 %v1982_v54  ;;  %928 = vmatprep.mubr.f32.mxu1 %v2416_v1  ;;  %v1180_v54 = vld [vmem:[#allocation8 + $0x168] sm:$0xff]  ;;  %v2022_v57 = vpack.c.bf16 %v1177_v53, %v1175_v52  ;;  %v1179_v59 = vld [vmem:[#allocation8 + $0x160] sm:$0xff] }
 0x1b5   : > { %1985 = vmatprep.subr.bf16.mxu1 %v1984_v56  ;;  %1927 = vmatmul.mubr.msk.f32.vlgmr.msra.gmra.mrb[6].mxu0 %vm599_vm3, %v1091_v34  ;;  %v1182_v56 = vld [vmem:[#allocation8 + $0x178] sm:$0xff]  ;;  %v1519_v53 = vld [vmem:[#allocation8 + $0x288] sm:$0xff] }
 0x1b6   : > { %1263 = vmatprep.mubr.f32.mxu0 %v2416_v1  ;;  %2013 = vmatprep.subr.bf16.mxu0 %v2012_v38  ;;  %v2024_v58 = vpack.c.bf16 %v1182_v56, %v1180_v54  ;;  %v1196_v38 = vld [vmem:[#allocation8 + $0x1e8] sm:$0xff]  ;;  %v1521_v54 = vld [vmem:[#allocation8 + $0x298] sm:$0xff]  ;;  %v1518_v56 = vld [vmem:[#allocation8 + $0x280] sm:$0xff] }
 0x1b7   : > { %2015 = vmatpush1.bf16.msra.mxu0 %v2014_v44  ;;  %v2040_v41 = vpack.c.bf16 %v1198_v39, %v1196_v38  ;;  %v1197_v44 = vld [vmem:[#allocation8 + $0x1f0] sm:$0xff] }
 0x1b8   : > { %1987 = vmatpush1.bf16.msra.mxu1 %v1986_v62  ;;  %2017 = vmatprep.subr.bf16.mxu0 %v2016_v45  ;;  %v1186_v62 = vld [vmem:[#allocation8 + $0x198] sm:$0xff]  ;;  %v1515_v45 = vld [vmem:[#allocation8 + $0x268] sm:$0xff] }
 0x1b9   : > { %1989 = vmatprep.subr.bf16.mxu1 %v1988_v63  ;;  %v2026_v63 = vpack.c.bf16 %v1181_v60, %v1179_v59  ;;  %v2028_v0 = vpack.c.bf16 %v1186_v62, %v1184_v61  ;;  %v2056_v47 = vpack.c.bf16 %v1517_v46, %v1515_v45  ;;  %v1523_v59 = vld [vmem:[#allocation8 + $0x2a8] sm:$0xff]  ;;  %v1525_v60 = vld [vmem:[#allocation8 + $0x2b8] sm:$0xff] }
 0x1ba   : > { %v2064_v62 = vpack.c.bf16 %v1525_v60, %v1523_v59 }
 0x1bb   : > { %2019 = vmatpush1.bf16.msra.mxu0 %v2018_v50 }
 0x1bc   : > { %1991 = vmatpush1.bf16.msra.mxu1 %v1990_v5  ;;  %2021 = vmatprep.subr.bf16.mxu0 %v2020_v51  ;;  %v1190_v5 = vld [vmem:[#allocation8 + $0x1b8] sm:$0xff]  ;;  %v2058_v51 = vpack.c.bf16 %v1516_v49, %v1514_v48 }
 0x1bd   : > { %1993 = vmatprep.subr.bf16.mxu1 %v1992_v6  ;;  %v2030_v6 = vpack.c.bf16 %v1185_v3, %v1183_v2  ;;  %v2032_v7 = vpack.c.bf16 %v1190_v5, %v1188_v4  ;;  %v1527_v2 = vld [vmem:[#allocation8 + $0x2c8] sm:$0xff]  ;;  %v1529_v3 = vld [vmem:[#allocation8 + $0x2d8] sm:$0xff] }
 0x1be   : > { %v2068_v5 = vpack.c.bf16 %v1529_v3, %v1527_v2 }
 0x1bf   : > { %2023 = vmatpush1.bf16.msra.mxu0 %v2022_v57  ;;  %v2060_v57 = vpack.c.bf16 %v1521_v54, %v1519_v53 }
 0x1c0   : > { %1995 = vmatpush1.bf16.msra.mxu1 %v1994_v11  ;;  %2025 = vmatprep.subr.bf16.mxu0 %v2024_v58  ;;  %v1194_v11 = vld [vmem:[#allocation8 + $0x1d8] sm:$0xff]  ;;  %v1520_v58 = vld [vmem:[#allocation8 + $0x290] sm:$0xff] }
 0x1c1   : > { %1997 = vmatprep.subr.bf16.mxu1 %v1996_v12  ;;  %v2034_v12 = vpack.c.bf16 %v1189_v9, %v1187_v8  ;;  %v2036_v13 = vpack.c.bf16 %v1194_v11, %v1192_v10  ;;  %v2062_v61 = vpack.c.bf16 %v1520_v58, %v1518_v56  ;;  %v1531_v8 = vld [vmem:[#allocation8 + $0x2e8] sm:$0xff]  ;;  %v1533_v9 = vld [vmem:[#allocation8 + $0x2f8] sm:$0xff] }
 0x1c2   : > { %v2072_v11 = vpack.c.bf16 %v1533_v9, %v1531_v8 }
 0x1c3   : > { %2027 = vmatpush1.bf16.msra.mxu0 %v2026_v63  ;;  %v1522_v63 = vld [vmem:[#allocation8 + $0x2a0] sm:$0xff] }
 0x1c4   : > { %1999 = vmatpush1.bf16.msra.mxu1 %v1998_v17  ;;  %2029 = vmatprep.subr.bf16.mxu0 %v2028_v0  ;;  %v1278_v17 = vld [vmem:[#allocation10 + $0x1c] sm:$0xf]  ;;  %v1524_v0 = vld [vmem:[#allocation8 + $0x2b0] sm:$0xff] }
 0x1c5   : > { %2001 = vmatprep.subr.bf16.mxu1 %v2000_v18  ;;  %v1503_v18 = vld [vmem:[#allocation8 + $0x208] sm:$0xff]  ;;  %v2066_v4 = vpack.c.bf16 %v1524_v0, %v1522_v63 }
 0x1c7   : > { %2031 = vmatpush1.bf16.msra.mxu0 %v2030_v6  ;;  %v1526_v6 = vld [vmem:[#allocation8 + $0x2c0] sm:$0xff] }
 0x1c8   : > { %2003 = vmatpush1.bf16.msra.mxu1 %v2002_v23  ;;  %2033 = vmatprep.subr.bf16.mxu0 %v2032_v7  ;;  %v1509_v23 = vld [vmem:[#allocation8 + $0x238] sm:$0xff]  ;;  %v1528_v7 = vld [vmem:[#allocation8 + $0x2d0] sm:$0xff] }
 0x1c9   : > { %2005 = vmatprep.subr.bf16.mxu1 %v2004_v24  ;;  %v1426_v24 = vld [vmem:[#allocation10 + $0x20] sm:$0xf]  ;;  %v2048_v26 = vpack.c.bf16 %v1509_v23, %v1507_v22  ;;  %v2070_v10 = vpack.c.bf16 %v1528_v7, %v1526_v6  ;;  %v595_v23 = vld [vmem:[%s2842_s5] sm:$0xff] }
 0x1cb   : > { %2035 = vmatpush1.bf16.msra.mxu0 %v2034_v12  ;;  %v1530_v12 = vld [vmem:[#allocation8 + $0x2e0] sm:$0xff] }
 0x1cc   : > { %2007 = vmatpush1.bf16.msra.mxu1 %v2006_v29  ;;  %2037 = vmatprep.subr.bf16.mxu0 %v2036_v13  ;;  %v2050_v29 = vpack.c.bf16 %v1508_v28, %v1506_v27  ;;  %v1532_v13 = vld [vmem:[#allocation8 + $0x2f0] sm:$0xff] }
 0x1cd   : > { %2009 = vmatprep.subr.bf16.mxu1 %v2008_v30  ;;  %v1193_v30 = vld [vmem:[#allocation8 + $0x1d0] sm:$0xff] }
 0x1d0   : > { %2011 = vmatpush1.bf16.msra.mxu1 %v2010_v33  ;;  %v1513_v33 = vld [vmem:[#allocation8 + $0x258] sm:$0xff] }
 0x1d1   : > { %1914 = vmatprep.subr.mxu1 %v2416_v1  ;;  %v2052_v34 = vpack.c.bf16 %v1513_v33, %v1511_v32 }
 0x286   : > { %v827_v14 = vpop.f32.mrb[0].mxu1 }
 0x287   : > { %v1913_v15 = vpop.f32.mrb[1].mxu1  ;;  %929 = vmatmul.mubr.f32.vlgmr.msra.gmra.mrb[2].mxu1 %v827_v14  ;;  %v2074_v14 = vpack.c.bf16 %v1532_v13, %v1530_v12 }
 0x288   : > { %1915 = vmatpush3.msk.msra.mxu1 %vm603_vm2, %v2735_v43  ;;  %1916 = vmatprep.mubr.msk.f32.mxu1 %vm2415_vm0, %v2416_v1  ;;  %v1161_v50 = vpop.f32.mrb[6].mxu0 }
 0x289   : > { %1929 = vmatprep.subr.mxu1 %v2416_v1  ;;  %v1928_v52 = vpop.f32.mrb[7].mxu0 }
 0x28b   : > { %1917 = vmatmul.mubr.msk.f32.vlgmr.msra.gmra.mrb[4].mxu1 %vm599_vm3, %v943_v16 }
 0x28c   : > { %1930 = vmatpush3.msk.msra.mxu1 %vm603_vm2, %v2735_v43  ;;  %1931 = vmatprep.mubr.msk.f32.mxu1 %vm2415_vm0, %v2416_v1  ;;  %v2044_v43 = vpack.c.bf16 %v1505_v19, %v1503_v18 }
 0x28d   : > { %1934 = vmatprep.subr.mxu1 %v2416_v1 }
 0x28f   : > { %1932 = vmatmul.mubr.msk.f32.vlgmr.msra.gmra.mrb[6].mxu1 %vm599_vm3, %v1278_v17 }
 0x290   : > { %1935 = vmatpush3.msk.msra.mxu1 %vm603_vm2, %v2727_v40  ;;  %1936 = vmatprep.mubr.msk.f32.mxu1 %vm2415_vm0, %v2416_v1  ;;  %v1504_v40 = vld [vmem:[#allocation8 + $0x210] sm:$0xff] }
 0x291   : > { %1939 = vmatprep.subr.mxu1 %v2416_v1  ;;  %v2046_v25 = vpack.c.bf16 %v1504_v40, %v1502_v21  ;;  %v348_v40 = vld [vmem:[%s2685_s20] sm:$0xff] }
 0x292   : > { %v350_v22 = vcombine.high %v348_v40, %v348_v40  ;;  %352 = vst [vmem:[%s347_s11] sm:$0xf] %v348_v40 }
 0x294   : > { %353 = vst [vmem:[%s347_s11 + $0x8] sm:$0xf] %v350_v22 }
 0x297   : > { %1937 = vmatmul.mubr.msk.f32.vlgmr.msra.gmra.mrb[6].mxu1 %vm599_vm3, %v1276_v20 }
 0x298   : > { %1940 = vmatpush3.msk.msra.mxu1 %vm603_vm2, %v2749_v55  ;;  %1941 = vmatprep.mubr.msk.f32.mxu1 %vm2415_vm0, %v2416_v1  ;;  %v1191_v55 = vld [vmem:[#allocation8 + $0x1c0] sm:$0xff] }
 0x299   : > { %2045 = vmatprep.subr.bf16.mxu1 %v2044_v43  ;;  %v2038_v31 = vpack.c.bf16 %v1193_v30, %v1191_v55 }
 0x29b   : > { %2039 = vmatpush1.bf16.msra.mxu0 %v2038_v31 }
 0x29c   : > { %2041 = vmatprep.subr.bf16.mxu0 %v2040_v41 }
 0x29f   : > { %1942 = vmatmul.mubr.msk.f32.vlgmr.msra.gmra.mrb[6].mxu1 %vm599_vm3, %v1426_v24 }
 0x2a0   : > { %2047 = vmatpush1.bf16.msra.mxu1 %v2046_v25  ;;  %1598 = vmatprep.mubr.f32.mxu1 %v2416_v1  ;;  %v2042_v1 = vpack.c.bf16 %v1197_v44, %v1195_v42 }
 0x2a1   : > { %2049 = vmatprep.subr.bf16.mxu1 %v2048_v26 }
 0x2a2   : > { %2043 = vmatpush1.bf16.msra.mxu0 %v2042_v1 }
 0x2a4   : > { %2051 = vmatpush1.bf16.msra.mxu1 %v2050_v29 }
 0x2a5   : > { %2053 = vmatprep.subr.bf16.mxu1 %v2052_v34 }
 0x2a8   : > { %2055 = vmatpush1.bf16.msra.mxu1 %v2054_v37 }
 0x2a9   : > { %2057 = vmatprep.subr.bf16.mxu1 %v2056_v47 }
 0x2ac   : > { %2059 = vmatpush1.bf16.msra.mxu1 %v2058_v51 }
 0x2ad   : > { %2061 = vmatprep.subr.bf16.mxu1 %v2060_v57 }
 0x2b0   : > { %2063 = vmatpush1.bf16.msra.mxu1 %v2062_v61 }
 0x2b1   : > { %2065 = vmatprep.subr.bf16.mxu1 %v2064_v62 }
 0x2b4   : > { %2067 = vmatpush1.bf16.msra.mxu1 %v2066_v4 }
 0x2b5   : > { %2069 = vmatprep.subr.bf16.mxu1 %v2068_v5 }
 0x2b8   : > { %2071 = vmatpush1.bf16.msra.mxu1 %v2070_v10 }
 0x2b9   : > { %2073 = vmatprep.subr.bf16.mxu1 %v2072_v11 }
 0x2bc   : > { %2075 = vmatpush1.bf16.msra.mxu1 %v2074_v14 }
 0x35a   : > { %v930_v15 = vpop.f32.mrb[2].mxu1 }
 0x35b   : > { %v932_v16 = vpop.f32.mrb[3].mxu1 }
 0x35c   : > { %v937_v17 = vcombine.low %v930_v15, %v932_v16 }
 0x35e   : > { %v1013_v18 = vpop.f32.mrb[4].mxu1  ;;  %v939_v26 = vadd.f32 %v937_v17, %v595_v23 }
 0x35f   : > { %v2076_v19 = vadd.f32 %v1161_v50, %v1013_v18  ;;  %v1918_v20 = vpop.f32.mrb[5].mxu1 }
 0x361   : > { %1264 = vmatmul.mubr.f32.vlgmr.msra.gmra.mrb[8].mxu0 %v2076_v19 }
 0x372   : > { %v1496_v43 = vpop.f32.mrb[6].mxu1 }
 0x373   : > { %v1943_v21 = vpop.f32.mrb[7].mxu1  ;;  %1599 = vmatmul.mubr.f32.vlgmr.msra.gmra.mrb[8].mxu1 %v1496_v43 }
 0x434   : > { %v1265_v24 = vpop.f32.mrb[8].mxu0 }
 0x435   : > { %v1267_v25 = vpop.f32.mrb[9].mxu0 }
 0x436   : > { %v1272_v27 = vcombine.low %v1265_v24, %v1267_v25 }
 0x438   : > { %v1274_v28 = vadd.f32 %v1272_v27, %v939_v26 }
 0x446   : > { %v1600_v29 = vpop.f32.mrb[8].mxu1 }
 0x447   : > { %v1602_v55 = vpop.f32.mrb[9].mxu1 }
 0x448   : > { %v1607_v30 = vcombine.low %v1600_v29, %v1602_v55 }
 0x44a   : > { %v1609_v31 = vadd.f32 %v1607_v30, %v1274_v28 }
 0x44c   : > { %v1611_v32 = vcombine.low %v1609_v31, %v1609_v31  ;;  %1614 = vst [vmem:[%s347_s11 + $0x8] sm:$0xf0] %v1609_v31 }
 0x44e   : > { %1613 = vst [vmem:[%s347_s11] sm:$0xf0] %v1611_v32 }
 0x44f   : > { %2336 = shalt.err (!%p2333_p10)
}
 0x450   : > { %s2337_s2 = scalar_lea.hbm %s2793_s10, 256  ;;  %s2341_s20 = scalar_lea.hbm %s2843_s6, 512 }
 0x451   : > { %p2338_p13 = scmp.ne.s32.totalorder %s2793_s10, %s2337_s2  ;;  %p2342_p9 = scmp.lt.u32.totalorder %s2793_s10, %s2843_s6 }
 0x452   : > { %p2343_p3 = scmp.lt.u32.totalorder %s2341_s20, %s2337_s2  ;;  %p2345_p12 = scmp.lt.u32.totalorder %s2337_s2, %s2793_s10 }
 0x453   : > { %p2339_p5 = pnand %p2338_p13, %p2867_p2 }
 0x454   : > { %p2344_p7 = por %p2343_p3, %p2342_p9 }
 0x455   : > { %p2340_p11 = pneg %p2339_p5 }
 0x456   : > { %p2346_p1 = por %p2345_p12, %p2344_p7 }
 0x458   : > { %p2347_p4 = pnand %p2346_p1, %p2340_p11 }
 0x45a   : > { %2350 = shalt.err (!%p2347_p4)
}
 0x45b   : > { %2103 = dma.vmem_to_hbm [thread:$0]  (%p2867_p2), %s2795_s9, 256, %s2793_s10, %s1616_s17  }
 0x45c PF: > { %s1642_s19 = sand.u32 1, %s2389_s21   ;;  %p2868_p0 = scmp.ne.s32.totalorder %s2851_s28, 0 }
 0x45d   : > { %p2869_p8 = scmp.ge.s32.totalorder %s2401_s24, 2  ;;  %s1643_s26 = scalar_lea.sflag [#allocation4], %s1642_s19 }
 0x45f   : > { %p2123_p6 = pnand %p2869_p8, %p2868_p0 }
 0x461   : > { %2384 = dma.done.wait (!%p2123_p6), %s1643_s26, 256  }
 0x462   : > { %2386 = vsyncadd (!%p2123_p6), %s1643_s26, 4294967040  ;;  %p23_p10 = scmp.ge.s32.totalorder %s2581_s30, 4   ;;  %s2870_s21 = smov %s2393_s22 }
 0x463   : > { %s2871_s22 = smov %s2397_s23  ;;  %s2872_s23 = smov %s2591_s13 }
 0x464   : > { %s2873_s24 = smov %s2581_s30  ;;  %25 = sbr.rel (!%p23_p10) target bundleno = 11 (0xb), region = 126 }
 0x46b   :  { %1648 = vsyncpa [#allocation3], 1 }
 0x46c   :  { %1650 = vsyncpa [#allocation3 + $0x1], 1 }
 0x46d   :  { %1651 = vsyncpa [#allocation6], 1 }
 0x46e   :  { %1653 = vsyncpa [#allocation6 + $0x1], 1 }
 0x46f   :  { %1654 = vsyncpa [#allocation9], 1 }
 0x470   :  { %1655 = vsyncpa [#allocation4], 1 }
 0x471   :  { %1657 = vsyncpa [#allocation4 + $0x1], 1 }

</bundles_post_ra>
